<compile_context>
chip_gen: v6e
topology: v6e:2x2x1
jax: 0.10.0
libtpu: 0.0.40
codegen_flags: <defaults>
</compile_context>

<pallas_src>
import jax
import jax.numpy as jnp
from jax.experimental import pallas as pl
from jax.experimental.pallas import tpu as pltpu


def _round_up(x, m):
    return (x + m - 1) // m * m


def _choose_tk(K, tk_max):
    """Pick the K tile so it divides the (possibly padded) K exactly."""
    if K <= tk_max:
        return K, K                      # single K step, block == full dim
    for m in range(tk_max // 128, 0, -1):
        t = m * 128
        if K % t == 0:
            return t, K                  # exact divisor -> no padding anywhere
    # Rare fallback: K > tk_max and K not a multiple of 128 -> pad K.
    return tk_max, _round_up(K, tk_max)


def _vmem_limit_bytes():
    try:
        cap = int(pltpu.get_tpu_info().vmem_capacity_bytes)
    except Exception:
        cap = 128 * 1024 * 1024
    return int(min(cap * 3 // 4, 96 * 1024 * 1024))


def _embed_kernel(x_ref, w_ref, b_ref, o_ref):
    """One (tm, tn) output tile, accumulated in-place over the K grid axis."""
    k = pl.program_id(2)

    @pl.when(k == 0)
    def _():
        # Output block index is k-invariant -> stays resident in VMEM across
        # the K axis; initialize it with the broadcast bias (f32).
        o_ref[...] = jnp.broadcast_to(b_ref[...], o_ref.shape).astype(o_ref.dtype)

    # Hot loop: cast the f32 x block to bf16 on-chip (saves a wrapper-side HBM
    # pass) and accumulate in f32 directly into the resident output block.
    o_ref[...] += jnp.dot(
        x_ref[...].astype(jnp.bfloat16),
        w_ref[...],
        preferred_element_type=jnp.float32,
    )


def make_input_module(w, b, *, tm=256, tn=512, tk_max=2048):
    """Build forward(x) for a concrete InputModule: flatten(x) @ w + b.

    w: (K, E) float weights (K = prod of x's non-batch dims), cast to bf16 once.
    b: (E,)   float bias.
    Returns a jitted forward(x) -> (batch_size, embedding_size) float32.
    """
    K, E = int(w.shape[0]), int(w.shape[1])
    tk, K_pad = _choose_tk(K, tk_max)

    # One-time parameter prep ("stored persistently in bf16").
    w_bf = w.astype(jnp.bfloat16)
    if K_pad != K:
        # Zero-pad K only in the rare no-nice-divisor fallback.
        w_bf = jnp.pad(w_bf, ((0, K_pad - K), (0, 0)))
    b2d = b.reshape(1, E).astype(jnp.float32)

    vmem_limit = _vmem_limit_bytes()

    def forward(x):
        B = int(x.shape[0])
        x_flat = x.reshape(B, K)          # contiguous reshape: no cast, no copy
        if K_pad != K:                    # rare fallback (see _choose_tk)
            x_flat = jnp.pad(x_flat, ((0, 0), (0, K_pad - K)))

        # Tile clamps: tm multiple of 8 (f32 sublanes), tn multiple of 128 or
        # the full E.  Partial blocks along B / E are safe: OOB output elements
        # are never stored, and matmul rows/cols are independent.
        tm_ = min(tm, _round_up(B, 8))
        tn_ = E if E <= tn else tn

        # v7x megacore: ensure >=2 blocks along a parallel axis when possible.
        if pl.cdiv(B, tm_) * pl.cdiv(E, tn_) == 1 and tn_ >= 256:
            tn_ = _round_up(pl.cdiv(tn_, 2), 128)

        grid = (pl.cdiv(B, tm_), pl.cdiv(E, tn_), K_pad // tk)

        cost = pl.CostEstimate(
            flops=2 * B * K * E,
            transcendentals=0,
            bytes_accessed=(
                B * K_pad * 4                 # x read once (f32)
                + grid[0] * K_pad * E * 2     # w re-streamed once per B tile (bf16)
                + E * 4                       # bias (f32)
                + B * E * 4                   # output (f32)
            ),
        )

        return pl.pallas_call(
            _embed_kernel,
            out_shape=jax.ShapeDtypeStruct((B, E), jnp.float32),
            grid_spec=pltpu.PrefetchScalarGridSpec(
                num_scalar_prefetch=0,
                grid=grid,
                in_specs=[
                    pl.BlockSpec((tm_, tk), lambda i, j, k: (i, k)),
                    # W block index ignores i -> full weight re-streamed once
                    # per B tile; tm is large so typical batches need 1-2 tiles.
                    pl.BlockSpec((tk, tn_), lambda i, j, k: (k, j)),
                    # bias block index independent of k -> DMA'd once per (i, j).
                    pl.BlockSpec((1, tn_), lambda i, j, k: (0, j)),
                ],
                out_specs=pl.BlockSpec((tm_, tn_), lambda i, j, k: (i, j)),
            ),
            compiler_params=pltpu.CompilerParams(
                # K is the reduction (output-resident) axis; B/E tiles are
                # independent and shard across v7x's two TensorCores.
                dimension_semantics=("parallel", "parallel", "arbitrary"),
                vmem_limit_bytes=vmem_limit,
            ),
            cost_estimate=cost,
        )(x_flat, w_bf, b2d)

    return jax.jit(forward)


if __name__ == "__main__":
    # Small shapes consistent with "unspecified input -> (batch, embedding)":
    # batch=2, channels=4, spatial=16x16, embedding_size=32.
    B, C, H, W = 2, 4, 16, 16
    EMBED = 32
    K = C * H * W

    key = jax.random.PRNGKey(0)
    kx, kw, kb = jax.random.split(key, 3)
    x = jax.random.normal(kx, (B, C, H, W), dtype=jnp.float32)
    # Deterministic parameter init (Kaiming-ish scale), not a checkpoint load.
    w = jax.random.normal(kw, (K, EMBED), dtype=jnp.float32) * (1.0 / jnp.sqrt(K))
    b = jax.random.normal(kb, (EMBED,), dtype=jnp.float32) * 0.01

    forward = make_input_module(w, b)
    out = jax.block_until_ready(forward(x))

    # Cross-check against plain f32 JAX reference (bf16 MXU operands -> loose tol).
    ref = x.reshape(B, K) @ w + b
    assert out.shape == (B, EMBED)
    assert jnp.allclose(out, ref, atol=3e-2, rtol=3e-2), float(
        jnp.max(jnp.abs(out - ref))
    )

    print("KERNEL_OK")
</pallas_src>

<mosaic_0001>
module attributes {stable_mosaic.version = 11 : i64} {
  func.func @_embed_kernel(%arg0: i32, %arg1: i32, %arg2: i32, %arg3: memref<8x1024xf32, #tpu.memory_space<vmem>>, %arg4: memref<1024x32xbf16, #tpu.memory_space<vmem>>, %arg5: memref<1x32xf32, #tpu.memory_space<vmem>>, %arg6: memref<8x32xf32, #tpu.memory_space<vmem>>) attributes {dimension_semantics = [#tpu.dimension_semantics<parallel>, #tpu.dimension_semantics<parallel>, #tpu.dimension_semantics<arbitrary>], iteration_bounds = array<i64: 1, 1, 1>, scalar_prefetch = 0 : i64, scratch_operands = 0 : i64, tpu.core_type = #tpu.core_type<tc>, window_params = [{transform_indices = @transform_0, window_bounds = array<i64: 8, 1024>}, {transform_indices = @transform_1, window_bounds = array<i64: 1024, 32>}, {transform_indices = @transform_2, window_bounds = array<i64: 1, 32>}, {transform_indices = @transform_3, window_bounds = array<i64: 8, 32>}]} {
    %c0_i32 = arith.constant 0 : i32
    %0 = arith.cmpi eq, %arg2, %c0_i32 : i32
    %1 = arith.extui %0 : i1 to i32
    %c0_i32_0 = arith.constant 0 : i32
    %2 = arith.cmpi ne, %1, %c0_i32_0 : i32
    scf.if %2 {
      %c0_8 = arith.constant 0 : index
      %c0_9 = arith.constant 0 : index
      %10 = vector.load %arg5[%c0_8, %c0_9] : memref<1x32xf32, #tpu.memory_space<vmem>>, vector<1x32xf32>
      %11 = vector.shape_cast %10 : vector<1x32xf32> to vector<1x32xf32>
      %12 = vector.broadcast %11 : vector<1x32xf32> to vector<8x32xf32>
      %c0_10 = arith.constant 0 : index
      %c0_11 = arith.constant 0 : index
      %13 = vector.load %arg6[%c0_10, %c0_11] : memref<8x32xf32, #tpu.memory_space<vmem>>, vector<8x32xf32>
      tpu.vector_store %arg6[%c0_10, %c0_11], %12 {strides = array<i32>} : memref<8x32xf32, #tpu.memory_space<vmem>>, vector<8x32xf32>,
    } else {
    }
    %c0 = arith.constant 0 : index
    %c0_1 = arith.constant 0 : index
    %3 = vector.load %arg6[%c0, %c0_1] : memref<8x32xf32, #tpu.memory_space<vmem>>, vector<8x32xf32>
    %c0_2 = arith.constant 0 : index
    %c0_3 = arith.constant 0 : index
    %4 = vector.load %arg3[%c0_2, %c0_3] : memref<8x1024xf32, #tpu.memory_space<vmem>>, vector<8x1024xf32>
    %5 = arith.truncf %4 : vector<8x1024xf32> to vector<8x1024xbf16>
    %c0_4 = arith.constant 0 : index
    %c0_5 = arith.constant 0 : index
    %6 = vector.load %arg4[%c0_4, %c0_5] : memref<1024x32xbf16, #tpu.memory_space<vmem>>, vector<1024x32xbf16>
    %cst = arith.constant dense<0.000000e+00> : vector<8x32xf32>
    %7 = tpu.matmul %5, %6, %cst {dimension_numbers = #tpu.dot_dimension_numbers<[1], [0], [0], [1], [0, 0, 1, 1], [], []>} : vector<8x1024xbf16>, vector<1024x32xbf16>, vector<8x32xf32> -> vector<8x32xf32>
    %8 = arith.addf %3, %7 : vector<8x32xf32>
    %c0_6 = arith.constant 0 : index
    %c0_7 = arith.constant 0 : index
    %9 = vector.load %arg6[%c0_6, %c0_7] : memref<8x32xf32, #tpu.memory_space<vmem>>, vector<8x32xf32>
    tpu.vector_store %arg6[%c0_6, %c0_7], %8 {strides = array<i32>} : memref<8x32xf32, #tpu.memory_space<vmem>>, vector<8x32xf32>,
    return
  }
  func.func @transform_0(%arg0: i32, %arg1: i32, %arg2: i32) -> (i32, i32) {
    %c0_i32 = arith.constant 0 : i32
    return %arg0, %arg2 : i32, i32
  }
  func.func @transform_1(%arg0: i32, %arg1: i32, %arg2: i32) -> (i32, i32) {
    %c0_i32 = arith.constant 0 : i32
    return %arg2, %arg1 : i32, i32
  }
  func.func @transform_2(%arg0: i32, %arg1: i32, %arg2: i32) -> (i32, i32) {
    %c0_i32 = arith.constant 0 : i32
    %c0_i32_0 = arith.constant 0 : i32
    return %c0_i32, %arg1 : i32, i32
  }
  func.func @transform_3(%arg0: i32, %arg1: i32, %arg2: i32) -> (i32, i32) {
    %c0_i32 = arith.constant 0 : i32
    return %arg0, %arg1 : i32, i32
  }
}

</mosaic_0001>

<bundles_post_ra>
// kernel: forward.1
= control target key start
LH: loop header
LB: loop body
LE: loop exit
PB: predicated region body
PF: predicated region fallthrough
CT: control target
= control target key end

     0   :  { %8 = vsyncpa [#allocation3], 0  ;;  %s1192_s0 = inlined_call_operand.vmem [shape: f32[2,1024], index: 0, kind: input, shape index: {}]   ;;  %s1193_s1 = inlined_call_operand.hbm [shape: bf16[1024,32], index: 1, kind: input, shape index: {}]   ;;  %s1194_s2 = inlined_call_operand.vmem [shape: f32[1,32], index: 2, kind: input, shape index: {}]   ;;  %s1195_s3 = inlined_call_operand.hbm [shape: f32[2,32], index: 3, kind: output, shape index: {}]  }
   0x1   :  { %9 = vsyncpa [#allocation4], 0  ;;  %s1120_s12 = smov [#allocation2]  }
   0x2   :  { %s17_s13 = sshll.u32 %s1120_s12, 4  ;;  %s18_s13 = int_to_ptr.vmem [resolvable:$true] %s17_s13 }
   0x3   :  { %s1084_s14 = scalar_lea.vmem %s18_s13, 8192  ;;  %p1089_p1 = scmp.lt.s32.totalorder %s18_s13, %s18_s13 }
   0x4   :  { %p1085_p0 = scmp.ne.s32.totalorder %s18_s13, %s1084_s14  ;;  %p1090_p2 = scmp.lt.s32.totalorder %s1084_s14, %s1084_s14 }
   0x6   :  { %p1091_p3 = por %p1090_p2, %p1089_p1 }
   0x8   :  { %p1092_p4 = pnand %p1091_p3, %p1085_p0 }
   0xa   :  { %1095 = shalt.err (!%p1092_p4)
}
   0xb   :  { %s1121_s15 = smov 64   ;;  %s1122_s16 = smov 4  }
   0xc   :  { %23 = dma.hbm_to_vmem [thread:$0]  %s1193_s1, 8192, %s18_s13, [#allocation3], %s1121_s15, %s1121_s15, %s1122_s16  }
   0xd   :  { %1116 = dma.done.wait [#allocation3], 8192  }
   0xe   :  { %1117 = vsyncadd [#allocation3], 4294959104  ;;  %v1000_v0 = vld [vmem:[#allocation2 + $0x78] sm:$0xff]   ;;  %v1004_v4 = vld [vmem:[#allocation2 + $0x70] sm:$0xff]   ;;  %v1123_v24 = vmov 1983009808   ;;  %v67_v26 = vlaneseq }
   0xf   :  { %v1001_v1 = vld [vmem:[#allocation2 + $0xf8] sm:$0xff]   ;;  %905 = vmatprep.subr.bf16.mxu0 %v1000_v0  ;;  %v1005_v5 = vld [vmem:[#allocation2 + $0xf0] sm:$0xff]   ;;  %v1008_v8 = vld [vmem:[#allocation2 + $0x68] sm:$0xff]   ;;  %v65_v25 = vunpack.c.l.s4 %v1123_v24  ;;  %vm41_vm0 = vcmask 261120  }
  0x10   :  { %v1002_v2 = vld [vmem:[#allocation2 + $0x38] sm:$0xff]   ;;  %927 = vmatprep.subr.bf16.mxu1 %v1001_v1  ;;  %v1006_v6 = vld [vmem:[#allocation2 + $0x30] sm:$0xff]   ;;  %v1009_v9 = vld [vmem:[#allocation2 + $0xe8] sm:$0xff]   ;;  %v68_v32 = vshrl.u32 %v67_v26, 7 }
  0x11   :  { %v1003_v3 = vld [vmem:[#allocation2 + $0xb8] sm:$0xff]   ;;  %906 = vmatpush3.bf16.msra.mxu0 %v1002_v2  ;;  %v1007_v7 = vld [vmem:[#allocation2 + $0xb0] sm:$0xff]   ;;  %v1010_v10 = vld [vmem:[#allocation2 + $0x28] sm:$0xff]   ;;  %v66_v31 = vunpack.c.0.s8 %v65_v25 }
  0x12   :  { %928 = vmatpush3.bf16.msra.mxu1 %v1003_v3  ;;  %907 = vmatprep.subr.bf16.mxu0 %v1004_v4  ;;  %v1011_v11 = vld [vmem:[#allocation2 + $0xa8] sm:$0xff]   ;;  %v1012_v12 = vld [vmem:[#allocation2 + $0x60] sm:$0xff]   ;;  %v1016_v16 = vld [vmem:[#allocation2 + $0x58] sm:$0xff]  }
  0x13   :  { %929 = vmatprep.subr.bf16.mxu1 %v1005_v5  ;;  %v1013_v13 = vld [vmem:[#allocation2 + $0xe0] sm:$0xff]   ;;  %v1017_v17 = vld [vmem:[#allocation2 + $0xd8] sm:$0xff]   ;;  %v1020_v20 = vld [vmem:[#allocation2 + $0x50] sm:$0xff]   ;;  %v1150_v37 = vsub.s32 %v66_v31, %v68_v32 }
  0x14   :  { %v1014_v14 = vld [vmem:[#allocation2 + $0x20] sm:$0xff]   ;;  %v1018_v18 = vld [vmem:[#allocation2 + $0x18] sm:$0xff]   ;;  %v1021_v21 = vld [vmem:[#allocation2 + $0xd0] sm:$0xff]  }
  0x15   :  { %908 = vmatpush3.bf16.msra.mxu0 %v1006_v6  ;;  %v1015_v15 = vld [vmem:[#allocation2 + $0xa0] sm:$0xff]   ;;  %v1019_v19 = vld [vmem:[#allocation2 + $0x98] sm:$0xff]   ;;  %v1022_v22 = vld [vmem:[#allocation2 + $0x10] sm:$0xff]  }
  0x16   :  { %930 = vmatpush3.bf16.msra.mxu1 %v1007_v7  ;;  %909 = vmatprep.subr.bf16.mxu0 %v1008_v8  ;;  %v1023_v23 = vld [vmem:[#allocation2 + $0x90] sm:$0xff]   ;;  %v1024_v27 = vld [vmem:[#allocation2 + $0x48] sm:$0xff]   ;;  %v1028_v33 = vld [vmem:[#allocation2 + $0x40] sm:$0xff]  }
  0x17   :  { %931 = vmatprep.subr.bf16.mxu1 %v1009_v9  ;;  %v1025_v28 = vld [vmem:[#allocation2 + $0xc8] sm:$0xff]   ;;  %v1029_v34 = vld [vmem:[#allocation2 + $0xc0] sm:$0xff]   ;;  %v1038_v44 = vld [vmem:[#allocation2 + $0x178] sm:$0xff]  }
  0x18   :  { %v1026_v29 = vld [vmem:[#allocation2 + $0x8] sm:$0xff]   ;;  %v1030_v35 = vld [vmem:[#allocation2] sm:$0xff]   ;;  %v1039_v47 = vld [vmem:[#allocation2 + $0x1f8] sm:$0xff]  }
  0x19   :  { %910 = vmatpush3.bf16.msra.mxu0 %v1010_v10  ;;  %v1027_v30 = vld [vmem:[#allocation2 + $0x88] sm:$0xff]   ;;  %v1031_v36 = vld [vmem:[#allocation2 + $0x80] sm:$0xff]   ;;  %v1040_v50 = vld [vmem:[#allocation2 + $0x138] sm:$0xff]  }
  0x1a   :  { %932 = vmatpush3.bf16.msra.mxu1 %v1011_v11  ;;  %911 = vmatprep.subr.bf16.mxu0 %v1012_v12  ;;  %v1032_v38 = vld [vmem:[%s1192_s0] ss:$16 sps:$4 sm:$0xff]   ;;  %v1036_v40 = vld [vmem:[%s1192_s0 + $0x4] ss:$16 sps:$4 sm:$0xff]   ;;  %v1041_v53 = vld [vmem:[#allocation2 + $0x1b8] sm:$0xff]  }
  0x1b   :  { %933 = vmatprep.subr.bf16.mxu1 %v1013_v13  ;;  %v1034_v39 = vld [vmem:[%s1192_s0 + $0x20] ss:$16 sps:$4 sm:$0xff]   ;;  %v1037_v41 = vld [vmem:[%s1192_s0 + $0x24] ss:$16 sps:$4 sm:$0xff]   ;;  %v70_v42 = vrot.slane %v1032_v38, %v1150_v37  ;;  %v77_v45 = vrot.slane %v1036_v40, %v1150_v37  ;;  %v1046_v62 = vld [vmem:[#allocation2 + $0x168] sm:$0xff]  }
  0x1c   :  { %v84_v43 = vrot.slane %v1034_v39, %v1150_v37  ;;  %v91_v46 = vrot.slane %v1037_v41, %v1150_v37  ;;  %v1042_v56 = vld [vmem:[#allocation2 + $0x170] sm:$0xff]   ;;  %v1047_v63 = vld [vmem:[#allocation2 + $0x1e8] sm:$0xff]   ;;  %v1050_v2 = vld [vmem:[#allocation2 + $0x160] sm:$0xff]  }
  0x1d   :  { %912 = vmatpush3.bf16.msra.mxu0 %v1014_v14  ;;  %v1043_v59 = vld [vmem:[#allocation2 + $0x1f0] sm:$0xff]   ;;  %v1048_v0 = vld [vmem:[#allocation2 + $0x128] sm:$0xff]   ;;  %v1051_v3 = vld [vmem:[#allocation2 + $0x1e0] sm:$0xff]  }
  0x1e   :  { %934 = vmatpush3.bf16.msra.mxu1 %v1015_v15  ;;  %913 = vmatprep.subr.bf16.mxu0 %v1016_v16  ;;  %v93_v48 = vcombine.high %v70_v42, %v84_v43  ;;  %v92_v49 = vcombine.low %v70_v42, %v84_v43  ;;  %v95_v51 = vcombine.high %v77_v45, %v91_v46  ;;  %v1044_v60 = vld [vmem:[#allocation2 + $0x130] sm:$0xff]   ;;  %v1049_v1 = vld [vmem:[#allocation2 + $0x1a8] sm:$0xff]   ;;  %v1052_v4 = vld [vmem:[#allocation2 + $0x120] sm:$0xff]  }
  0x1f   :  { %935 = vmatprep.subr.bf16.mxu1 %v1017_v17  ;;  %v94_v52 = vcombine.low %v77_v45, %v91_v46  ;;  %v1045_v61 = vld [vmem:[#allocation2 + $0x1b0] sm:$0xff]   ;;  %v1053_v5 = vld [vmem:[#allocation2 + $0x1a0] sm:$0xff]   ;;  %v1054_v6 = vld [vmem:[#allocation2 + $0x158] sm:$0xff]  }
  0x20   :  { %v141_v54 = vpack.c.bf16 %v93_v48, %v93_v48  ;;  %v140_v55 = vpack.c.bf16 %v92_v49, %v92_v49  ;;  %v143_v57 = vpack.c.bf16 %v95_v51, %v95_v51  ;;  %v1055_v7 = vld [vmem:[#allocation2 + $0x1d8] sm:$0xff]   ;;  %v1058_v10 = vld [vmem:[#allocation2 + $0x150] sm:$0xff]   ;;  %v1062_v14 = vld [vmem:[#allocation2 + $0x148] sm:$0xff]  }
  0x21   :  { %914 = vmatpush3.bf16.msra.mxu0 %v1018_v18  ;;  %v142_v58 = vpack.c.bf16 %v94_v52, %v94_v52  ;;  %v1056_v8 = vld [vmem:[#allocation2 + $0x118] sm:$0xff]   ;;  %v1059_v11 = vld [vmem:[#allocation2 + $0x1d0] sm:$0xff]   ;;  %v1063_v15 = vld [vmem:[#allocation2 + $0x1c8] sm:$0xff]  }
  0x22   :  { %936 = vmatpush3.bf16.msra.mxu1 %v1019_v19  ;;  %915 = vmatprep.subr.bf16.mxu0 %v1020_v20  ;;  %v1057_v9 = vld [vmem:[#allocation2 + $0x198] sm:$0xff]   ;;  %v1060_v12 = vld [vmem:[#allocation2 + $0x110] sm:$0xff]   ;;  %v1064_v16 = vld [vmem:[#allocation2 + $0x108] sm:$0xff]  }
  0x23   :  { %937 = vmatprep.subr.bf16.mxu1 %v1021_v21  ;;  %692 = vmatprep.mubr.bf16.mxu0 %v141_v54  ;;  %v1061_v13 = vld [vmem:[#allocation2 + $0x190] sm:$0xff]   ;;  %v1065_v17 = vld [vmem:[#allocation2 + $0x188] sm:$0xff]   ;;  %v1066_v18 = vld [vmem:[#allocation2 + $0x140] sm:$0xff]  }
  0x24   :  { %732 = vmatprep.mubr.bf16.mxu1 %v143_v57  ;;  %v1067_v19 = vld [vmem:[#allocation2 + $0x1c0] sm:$0xff]   ;;  %v1074_v24 = vld [vmem:[%s1192_s0 + $0xc] ss:$16 sps:$4 sm:$0xff]  }
  0x25   :  { %916 = vmatpush3.bf16.msra.mxu0 %v1022_v22  ;;  %v1068_v20 = vld [vmem:[#allocation2 + $0x100] sm:$0xff]   ;;  %v1070_v22 = vld [vmem:[%s1192_s0 + $0x8] ss:$16 sps:$4 sm:$0xff]   ;;  %v1075_v25 = vld [vmem:[%s1192_s0 + $0x2c] ss:$16 sps:$4 sm:$0xff]  }
  0x26   :  { %938 = vmatpush3.bf16.msra.mxu1 %v1023_v23  ;;  %917 = vmatprep.subr.bf16.mxu0 %v1024_v27  ;;  %v1069_v21 = vld [vmem:[#allocation2 + $0x180] sm:$0xff]   ;;  %v1072_v23 = vld [vmem:[%s1192_s0 + $0x28] ss:$16 sps:$4 sm:$0xff]   ;;  %v106_v26 = vrot.slane %v1070_v22, %v1150_v37 }
  0x27   :  { %939 = vmatprep.subr.bf16.mxu1 %v1025_v28  ;;  %v120_v27 = vrot.slane %v1072_v23, %v1150_v37  ;;  %v113_v28 = vrot.slane %v1074_v24, %v1150_v37  ;;  %v840_v39 = vld [vmem:[%s1194_s2] ss:$0 sm:$0xff] }
  0x28   :  { %42 = vst.msk [vmem:[#allocation5] sm:$0xff] %vm41_vm0, %v840_v39 }
  0x29   :  { %918 = vmatpush3.bf16.msra.mxu0 %v1026_v29  ;;  %v127_v29 = vrot.slane %v1075_v25, %v1150_v37  ;;  %v128_v31 = vcombine.low %v106_v26, %v120_v27 }
  0x2a   :  { %940 = vmatpush3.bf16.msra.mxu1 %v1027_v30  ;;  %919 = vmatprep.subr.bf16.mxu0 %v1028_v33  ;;  %v129_v30 = vcombine.high %v106_v26, %v120_v27 }
  0x2b   :  { %941 = vmatprep.subr.bf16.mxu1 %v1029_v34  ;;  %v131_v32 = vcombine.high %v113_v28, %v127_v29  ;;  %v130_v33 = vcombine.low %v113_v28, %v127_v29 }
  0x2c   :  { %v145_v34 = vpack.c.bf16 %v129_v30, %v129_v30 }
  0x2d   :  { %920 = vmatpush3.bf16.msra.mxu0 %v1030_v35  ;;  %v144_v35 = vpack.c.bf16 %v128_v31, %v128_v31  ;;  %v146_v38 = vpack.c.bf16 %v130_v33, %v130_v33 }
  0x2e   :  { %942 = vmatpush3.bf16.msra.mxu1 %v1031_v36  ;;  %949 = vmatprep.subr.bf16.mxu0 %v1038_v44  ;;  %v147_v36 = vpack.c.bf16 %v131_v32, %v131_v32 }
  0x2f   :  { %971 = vmatprep.subr.bf16.mxu1 %v1039_v47 }
  0x30   :  { %693 = vmatmul.mubr.bf16.vlgmr.msra.gmra.mxu0 %v140_v55 }
  0x31   :  { %733 = vmatmul.mubr.bf16.vlgmr.msra.gmra.mxu1 %v142_v58  ;;  %950 = vmatpush3.bf16.msra.mxu0 %v1040_v50 }
  0x32   :  { %972 = vmatpush3.bf16.msra.mxu1 %v1041_v53  ;;  %951 = vmatprep.subr.bf16.mxu0 %v1042_v56 }
  0x33   :  { %973 = vmatprep.subr.bf16.mxu1 %v1043_v59  ;;  %772 = vmatprep.mubr.bf16.mxu0 %v145_v34  ;;  %v43_v59 = vld [vmem:[#allocation5] sm:$0xff] }
  0x34   :  { %812 = vmatprep.mubr.bf16.mxu1 %v147_v36 }
  0x35   :  { %952 = vmatpush3.bf16.msra.mxu0 %v1044_v60 }
  0x36   :  { %974 = vmatpush3.bf16.msra.mxu1 %v1045_v61  ;;  %953 = vmatprep.subr.bf16.mxu0 %v1046_v62 }
  0x37   :  { %975 = vmatprep.subr.bf16.mxu1 %v1047_v63 }
  0x39   :  { %954 = vmatpush3.bf16.msra.mxu0 %v1048_v0 }
  0x3a   :  { %976 = vmatpush3.bf16.msra.mxu1 %v1049_v1  ;;  %955 = vmatprep.subr.bf16.mxu0 %v1050_v2 }
  0x3b   :  { %977 = vmatprep.subr.bf16.mxu1 %v1051_v3 }
  0x3d   :  { %956 = vmatpush3.bf16.msra.mxu0 %v1052_v4 }
  0x3e   :  { %978 = vmatpush3.bf16.msra.mxu1 %v1053_v5  ;;  %957 = vmatprep.subr.bf16.mxu0 %v1054_v6 }
  0x3f   :  { %979 = vmatprep.subr.bf16.mxu1 %v1055_v7 }
  0x41   :  { %958 = vmatpush3.bf16.msra.mxu0 %v1056_v8 }
  0x42   :  { %980 = vmatpush3.bf16.msra.mxu1 %v1057_v9  ;;  %959 = vmatprep.subr.bf16.mxu0 %v1058_v10 }
  0x43   :  { %981 = vmatprep.subr.bf16.mxu1 %v1059_v11 }
  0x45   :  { %960 = vmatpush3.bf16.msra.mxu0 %v1060_v12 }
  0x46   :  { %982 = vmatpush3.bf16.msra.mxu1 %v1061_v13  ;;  %961 = vmatprep.subr.bf16.mxu0 %v1062_v14 }
  0x47   :  { %983 = vmatprep.subr.bf16.mxu1 %v1063_v15 }
  0x49   :  { %962 = vmatpush3.bf16.msra.mxu0 %v1064_v16 }
  0x4a   :  { %984 = vmatpush3.bf16.msra.mxu1 %v1065_v17  ;;  %963 = vmatprep.subr.bf16.mxu0 %v1066_v18 }
  0x4b   :  { %985 = vmatprep.subr.bf16.mxu1 %v1067_v19 }
  0x4d   :  { %964 = vmatpush3.bf16.msra.mxu0 %v1068_v20 }
  0x4e   :  { %986 = vmatpush3.bf16.msra.mxu1 %v1069_v21 }
  0x50   :  { %773 = vmatmul.mubr.bf16.vlgmr.msra.gmra.mxu0 %v144_v35 }
  0x51   :  { %813 = vmatmul.mubr.bf16.vlgmr.msra.gmra.mxu1 %v146_v38 }
  0xf0   :  { %v921_v37 = vpop.f32.mrf.mxu0 }
  0xf1   :  { %v943_v40 = vpop.f32.mrf.mxu1 }
  0xf2   :  { %v922_v41 = vpop.f32.mrf.mxu0 }
  0xf3   :  { %v944_v42 = vpop.f32.mrf.mxu1  ;;  %v923_v47 = vadd.f32 %v922_v41, %v921_v37 }
  0xf4   :  { %v924_v43 = vpop.f32.mrf.mxu0  ;;  %v945_v48 = vadd.f32 %v944_v42, %v943_v40 }
  0xf5   :  { %v946_v44 = vpop.f32.mrf.mxu1 }
  0xf6   :  { %v925_v45 = vpop.f32.mrf.mxu0  ;;  %v735_v52 = vadd.f32 %v945_v48, %v923_v47 }
  0xf7   :  { %v947_v46 = vpop.f32.mrf.mxu1 }
 0x110   :  { %v965_v49 = vpop.f32.mrf.mxu0 }
 0x111   :  { %v987_v50 = vpop.f32.mrf.mxu1 }
 0x112   :  { %v966_v51 = vpop.f32.mrf.mxu0 }
 0x113   :  { %v967_v53 = vadd.f32 %v966_v51, %v965_v49  ;;  %v988_v54 = vpop.f32.mrf.mxu1 }
 0x114   :  { %v968_v55 = vpop.f32.mrf.mxu0  ;;  %v989_v57 = vadd.f32 %v988_v54, %v987_v50 }
 0x115   :  { %v775_v56 = vadd.f32 %v967_v53, %v735_v52  ;;  %v990_v58 = vpop.f32.mrf.mxu1 }
 0x116   :  { %v969_v60 = vpop.f32.mrf.mxu0 }
 0x117   :  { %v815_v61 = vadd.f32 %v989_v57, %v775_v56  ;;  %v991_v62 = vpop.f32.mrf.mxu1 }
 0x119   :  { %v820_v63 = vadd.f32 %v815_v61, %v43_v59 }
 0x11b   :  { %822 = vst.msk [vmem:[#allocation5] sm:$0xff] %vm41_vm0, %v820_v63 }
 0x11c   :  { %827 = vsyncadd [#allocation4], 96  ;;  %s1124_s2 = smov [#allocation5]  }
 0x11d   :  { %s828_s8 = sshll.u32 %s1124_s2, 4  ;;  %s829_s8 = int_to_ptr.vmem [resolvable:$true] %s828_s8 }
 0x11e   :  { %s1096_s9 = scalar_lea.vmem %s829_s8, 32  ;;  %s1100_s10 = scalar_lea.vmem %s829_s8, 128 }
 0x11f   :  { %p1097_p5 = scmp.ne.s32.totalorder %s829_s8, %s1096_s9  ;;  %p1101_p6 = scmp.lt.s32.totalorder %s829_s8, %s829_s8 }
 0x120   :  { %p1102_p7 = scmp.lt.s32.totalorder %s1100_s10, %s1096_s9 }
 0x122   :  { %p1103_p8 = por %p1102_p7, %p1101_p6 }
 0x124   :  { %p1104_p9 = pnand %p1103_p8, %p1097_p5 }
 0x126   :  { %1107 = shalt.err (!%p1104_p9)
}
 0x127   :  { %s1125_s11 = smov 32   ;;  %s1126_s12 = smov 2  }
 0x128   :  { %834 = dma.vmem_to_hbm [thread:$0]  %s829_s8, 32, %s1195_s3, [#allocation4], %s1125_s11, %s1125_s11, %s1126_s12  }
 0x129   :  { %1118 = dma.done.wait [#allocation4], 128  }
 0x12a   :  { %1119 = vsyncadd [#allocation4], 4294967168 }
 0x12b   :  { %838 = vsyncpa [#allocation3], 1 }
 0x12c   :  { %839 = vsyncpa [#allocation4], 1 }

</bundles_post_ra>
